<compile_context>
chip_gen: v5e
topology: v5e:2x2
jax: 0.10.0
libtpu: 0.0.40
codegen_flags: <defaults>
</compile_context>

<pallas_src>
import math
from functools import partial

import jax
import jax.numpy as jnp
import numpy as np
from jax import lax
from jax.experimental import pallas as pl
from jax.experimental.pallas import tpu as pltpu

# Small synthetic shapes consistent with the module.
N = 2            # batch
IN_CH = 4        # in_channels
OUT_CH = 8       # out_channels
H = W = 16       # spatial
RATES = (1, 3, 6, 9)
PAD = max(RATES)                  # y-padding only; x-padding lives in the bands
HP = H + 2 * PAD                  # 34
HPA = ((HP + 7) // 8) * 8         # 40: sublane-aligned padded height
KDIM = W * IN_CH                  # 64   (lane-packed input row width)
ODIM = W * OUT_CH                 # 128  (lane-dense output row width)
SHIFTS = (0,) + tuple(s for r in RATES for s in (-r, r))   # 9 row shifts
NSLICE = len(SHIFTS) + 1          # +1 for the global-average-pool K-slice

_HI = lax.Precision.HIGHEST       # host-side folding / reference / check only


def aspp_kernel(xp_ref, wfull_ref, bias_ref, o_ref, lhs_ref, *, precision):
    # xp_ref: (HPA, KDIM) y-zero-padded, lane-packed rows of one batch element.
    # lhs_ref: (H, NSLICE*KDIM) VMEM scratch holding the K-concatenated LHS.
    def tap(dy):
        # rows y+dy for y in [0, H): contiguous static row slice (no batch merge).
        return xp_ref[PAD + dy:PAD + dy + H, :]

    center = tap(0)
    lhs_ref[:, 0:KDIM] = center
    for s, dy in enumerate(SHIFTS[1:], start=1):
        lhs_ref[:, s * KDIM:(s + 1) * KDIM] = tap(dy)

    # Global-average-pool slice: sum over H (XLU reduce; the sum over W and the
    # 1/(H*W) scale live inside the weight slab), broadcast back over H rows.
    row_sum = jnp.sum(center, axis=0, keepdims=True)            # (1, KDIM)
    lhs_ref[:, len(SHIFTS) * KDIM:] = jnp.broadcast_to(row_sum, (H, KDIM))

    # Single fused MXU matmul: (H, 640) x (640, 128) -> all branches + projection.
    acc = jnp.dot(lhs_ref[...], wfull_ref[...],
                  preferred_element_type=jnp.float32, precision=precision)
    o_ref[...] = (acc + bias_ref[...]).astype(o_ref.dtype)


def fold_params(params):
    """Host-side folding: project every branch through the final 1x1 conv,
    fold x-taps (and x zero-padding) into banded (W*Cin, W*Cout) matrices per
    row shift, append the pooled branch, and stack everything along K."""
    w1, b1, wa, ba, wg, bg, wp, bp = params
    P = wp.reshape(6, OUT_CH, OUT_CH)                    # projection blocks per branch

    w1p = jnp.dot(w1, P[0], precision=_HI)                               # (Cin, Cout)
    wap = jnp.einsum('rabio,roc->rabic', wa, P[1:5], precision=_HI)      # (R,3,3,Cin,Cout)
    wgp = jnp.dot(wg, P[5], precision=_HI)                               # (Cin, Cout)
    bias = (jnp.dot(b1, P[0], precision=_HI)
            + jnp.einsum('ro,roc->c', ba, P[1:5], precision=_HI)
            + jnp.dot(bg, P[5], precision=_HI) + bp)                     # (Cout,)

    def shift_eye(off):
        # S[xi, xo] == 1 iff xi == xo + off; out-of-range -> 0 == x zero-padding.
        return jnp.eye(W, W, k=-off, dtype=jnp.float32)

    def band(w3, r):
        # w3: (3, Cin, Cout) taps over kx -> banded (W*Cin, W*Cout) matrix.
        return sum(jnp.kron(shift_eye((kx - 1) * r), w3[kx]) for kx in range(3))

    # shift 0: 1x1 conv + the ky==1 row of every dilated conv.
    mats = [jnp.kron(jnp.eye(W, dtype=jnp.float32), w1p)
            + sum(band(wap[ri, 1], r) for ri, r in enumerate(RATES))]
    # shifts -r / +r: ky==0 / ky==2 rows of each dilated conv (matches SHIFTS order).
    for ri, r in enumerate(RATES):
        mats.append(band(wap[ri, 0], r))   # dy = -r
        mats.append(band(wap[ri, 2], r))   # dy = +r
    # GAP branch: mean over (H, W), 1x1 conv, broadcast back over (H, W).
    mats.append(jnp.kron(jnp.ones((W, W), jnp.float32), wgp) / float(H * W))

    wfull = jnp.concatenate(mats, axis=0)              # (NSLICE*KDIM, ODIM) = (640, 128)
    bias_lane = jnp.tile(bias, W).reshape(1, ODIM)     # (1, 128)
    return wfull, bias_lane


def aspp_pallas(x_nhwc, params, *, precision=None):
    """x_nhwc: (N, H, W, IN_CH) float32. precision=None -> native MXU path."""
    wfull, bias_lane = fold_params(params)

    # y-padding (zero) to a sublane-aligned height; lane-pack (W, Cin) -> W*Cin.
    xp = jnp.pad(x_nhwc, ((0, 0), (PAD, HPA - H - PAD), (0, 0), (0, 0)))
    xp = xp.reshape(N, HPA, KDIM)

    out = pl.pallas_call(
        partial(aspp_kernel, precision=precision),
        out_shape=jax.ShapeDtypeStruct((N, H, ODIM), jnp.float32),
        grid=(N,),                                      # batch axis -> megacore on v7x
        in_specs=[
            pl.BlockSpec((None, HPA, KDIM), lambda b: (b, 0, 0)),
            pl.BlockSpec((NSLICE * KDIM, ODIM), lambda b: (0, 0)),
            pl.BlockSpec((1, ODIM), lambda b: (0, 0)),
        ],
        out_specs=pl.BlockSpec((None, H, ODIM), lambda b: (b, 0, 0)),
        scratch_shapes=[pltpu.VMEM((H, NSLICE * KDIM), jnp.float32)],
        compiler_params=pltpu.CompilerParams(
            dimension_semantics=("parallel",)),
    )(xp, wfull, bias_lane)

    return out.reshape(N, H, W, OUT_CH)


def init_params(key):
    """Deterministic parameter init (shapes from ASPP.__init__), NHWC layout."""
    ks = jax.random.split(key, 8)

    def u(k, shape, fan_in):
        b = 1.0 / math.sqrt(fan_in)
        return jax.random.uniform(k, shape, jnp.float32, -b, b)

    w1 = u(ks[0], (IN_CH, OUT_CH), IN_CH)
    b1 = u(ks[1], (OUT_CH,), IN_CH)
    wa = u(ks[2], (len(RATES), 3, 3, IN_CH, OUT_CH), IN_CH * 9)
    ba = u(ks[3], (len(RATES), OUT_CH), IN_CH * 9)
    wg = u(ks[4], (IN_CH, OUT_CH), IN_CH)
    bg = u(ks[5], (OUT_CH,), IN_CH)
    wp = u(ks[6], (6 * OUT_CH, OUT_CH), 6 * OUT_CH)
    bp = u(ks[7], (OUT_CH,), 6 * OUT_CH)
    return (w1, b1, wa, ba, wg, bg, wp, bp)


def aspp_reference(x_nhwc, params):
    """Pure-JAX/XLA reference matching the PyTorch forward semantics (NHWC),
    using the UNFOLDED parameters (validates the host-side folding too)."""
    w1, b1, wa, ba, wg, bg, wp, bp = params

    def conv(inp, w, b, dil, pad):
        y = lax.conv_general_dilated(
            inp, w, window_strides=(1, 1),
            padding=[(pad, pad), (pad, pad)],
            rhs_dilation=(dil, dil),
            dimension_numbers=('NHWC', 'HWIO', 'NHWC'),
            precision=_HI)
        return y + b

    outs = [conv(x_nhwc, w1.reshape(1, 1, IN_CH, OUT_CH), b1, 1, 0)]
    for ri, r in enumerate(RATES):
        outs.append(conv(x_nhwc, wa[ri], ba[ri], r, r))
    g = jnp.mean(x_nhwc, axis=(1, 2), keepdims=True)
    x6 = conv(g, wg.reshape(1, 1, IN_CH, OUT_CH), bg, 1, 0)
    outs.append(jnp.broadcast_to(x6, (x_nhwc.shape[0], H, W, OUT_CH)))
    cat = jnp.concatenate(outs, axis=-1)
    return conv(cat, wp.reshape(1, 1, 6 * OUT_CH, OUT_CH), bp, 1, 0)


if __name__ == "__main__":
    key = jax.random.PRNGKey(0)
    k_x, k_p = jax.random.split(key)

    # PyTorch input would be NCHW (2, 4, 16, 16); kernel uses NHWC (2, 16, 16, 4).
    x = jax.random.normal(k_x, (N, H, W, IN_CH), jnp.float32)
    params = init_params(k_p)

    # Production path: native MXU precision (fast path).
    out = jax.block_until_ready(aspp_pallas(x, params))
    # Verification path: HIGHEST precision so the tolerance is tight enough to
    # catch layout/indexing bugs (which produce O(1) errors).
    out_hi = jax.block_until_ready(
        aspp_pallas(x, params, precision=lax.Precision.HIGHEST))
    ref = jax.block_until_ready(aspp_reference(x, params))

    assert out.shape == (N, H, W, OUT_CH)
    np.testing.assert_allclose(np.asarray(out_hi), np.asarray(ref),
                               atol=2e-5, rtol=2e-5)
    np.testing.assert_allclose(np.asarray(out), np.asarray(ref),
                               atol=5e-2, rtol=5e-2)
    print("KERNEL_OK")
</pallas_src>

<mosaic_0001>
module attributes {stable_mosaic.version = 11 : i64} {
  func.func @aspp_kernel(%arg0: i32, %arg1: memref<1x40x64xf32, #tpu.memory_space<vmem>>, %arg2: memref<640x128xf32, #tpu.memory_space<vmem>>, %arg3: memref<1x128xf32, #tpu.memory_space<vmem>>, %arg4: memref<1x16x128xf32, #tpu.memory_space<vmem>>, %arg5: memref<16x640xf32, #tpu.memory_space<vmem>>) attributes {dimension_semantics = [#tpu.dimension_semantics<parallel>], iteration_bounds = array<i64: 2>, scalar_prefetch = 0 : i64, scratch_operands = 1 : i64, tpu.core_type = #tpu.core_type<tc>, window_params = [{transform_indices = @transform_0, window_bounds = array<i64: 1, 40, 64>}, {pipeline_mode = #tpu.pipeline_mode<synchronous>, transform_indices = @transform_1, window_bounds = array<i64: 640, 128>}, {pipeline_mode = #tpu.pipeline_mode<synchronous>, transform_indices = @transform_2, window_bounds = array<i64: 1, 128>}, {transform_indices = @transform_3, window_bounds = array<i64: 1, 16, 128>}]} {
    %c0 = arith.constant 0 : index
    %c9 = arith.constant 9 : index
    %c0_0 = arith.constant 0 : index
    %0 = vector.load %arg1[%c0, %c9, %c0_0] : memref<1x40x64xf32, #tpu.memory_space<vmem>>, vector<1x16x64xf32>
    %1 = vector.shape_cast %0 : vector<1x16x64xf32> to vector<16x64xf32>
    %c0_1 = arith.constant 0 : index
    %c0_2 = arith.constant 0 : index
    %2 = vector.load %arg5[%c0_1, %c0_2] : memref<16x640xf32, #tpu.memory_space<vmem>>, vector<16x64xf32>
    tpu.vector_store %arg5[%c0_1, %c0_2], %1 {strides = array<i32>} : memref<16x640xf32, #tpu.memory_space<vmem>>, vector<16x64xf32>,
    %c0_3 = arith.constant 0 : index
    %c8 = arith.constant 8 : index
    %c0_4 = arith.constant 0 : index
    %3 = vector.load %arg1[%c0_3, %c8, %c0_4] : memref<1x40x64xf32, #tpu.memory_space<vmem>>, vector<1x16x64xf32>
    %4 = vector.shape_cast %3 : vector<1x16x64xf32> to vector<16x64xf32>
    %c0_5 = arith.constant 0 : index
    %c64 = arith.constant 64 : index
    %5 = vector.load %arg5[%c0_5, %c64] : memref<16x640xf32, #tpu.memory_space<vmem>>, vector<16x64xf32>
    tpu.vector_store %arg5[%c0_5, %c64], %4 {strides = array<i32>} : memref<16x640xf32, #tpu.memory_space<vmem>>, vector<16x64xf32>,
    %c0_6 = arith.constant 0 : index
    %c10 = arith.constant 10 : index
    %c0_7 = arith.constant 0 : index
    %6 = vector.load %arg1[%c0_6, %c10, %c0_7] : memref<1x40x64xf32, #tpu.memory_space<vmem>>, vector<1x16x64xf32>
    %7 = vector.shape_cast %6 : vector<1x16x64xf32> to vector<16x64xf32>
    %c0_8 = arith.constant 0 : index
    %c128 = arith.constant 128 : index
    %8 = vector.load %arg5[%c0_8, %c128] : memref<16x640xf32, #tpu.memory_space<vmem>>, vector<16x64xf32>
    tpu.vector_store %arg5[%c0_8, %c128], %7 {strides = array<i32>} : memref<16x640xf32, #tpu.memory_space<vmem>>, vector<16x64xf32>,
    %c0_9 = arith.constant 0 : index
    %c6 = arith.constant 6 : index
    %c0_10 = arith.constant 0 : index
    %9 = vector.load %arg1[%c0_9, %c6, %c0_10] : memref<1x40x64xf32, #tpu.memory_space<vmem>>, vector<1x16x64xf32>
    %10 = vector.shape_cast %9 : vector<1x16x64xf32> to vector<16x64xf32>
    %c0_11 = arith.constant 0 : index
    %c192 = arith.constant 192 : index
    %11 = vector.load %arg5[%c0_11, %c192] : memref<16x640xf32, #tpu.memory_space<vmem>>, vector<16x64xf32>
    tpu.vector_store %arg5[%c0_11, %c192], %10 {strides = array<i32>} : memref<16x640xf32, #tpu.memory_space<vmem>>, vector<16x64xf32>,
    %c0_12 = arith.constant 0 : index
    %c12 = arith.constant 12 : index
    %c0_13 = arith.constant 0 : index
    %12 = vector.load %arg1[%c0_12, %c12, %c0_13] : memref<1x40x64xf32, #tpu.memory_space<vmem>>, vector<1x16x64xf32>
    %13 = vector.shape_cast %12 : vector<1x16x64xf32> to vector<16x64xf32>
    %c0_14 = arith.constant 0 : index
    %c256 = arith.constant 256 : index
    %14 = vector.load %arg5[%c0_14, %c256] : memref<16x640xf32, #tpu.memory_space<vmem>>, vector<16x64xf32>
    tpu.vector_store %arg5[%c0_14, %c256], %13 {strides = array<i32>} : memref<16x640xf32, #tpu.memory_space<vmem>>, vector<16x64xf32>,
    %c0_15 = arith.constant 0 : index
    %c3 = arith.constant 3 : index
    %c0_16 = arith.constant 0 : index
    %15 = vector.load %arg1[%c0_15, %c3, %c0_16] : memref<1x40x64xf32, #tpu.memory_space<vmem>>, vector<1x16x64xf32>
    %16 = vector.shape_cast %15 : vector<1x16x64xf32> to vector<16x64xf32>
    %c0_17 = arith.constant 0 : index
    %c320 = arith.constant 320 : index
    %17 = vector.load %arg5[%c0_17, %c320] : memref<16x640xf32, #tpu.memory_space<vmem>>, vector<16x64xf32>
    tpu.vector_store %arg5[%c0_17, %c320], %16 {strides = array<i32>} : memref<16x640xf32, #tpu.memory_space<vmem>>, vector<16x64xf32>,
    %c0_18 = arith.constant 0 : index
    %c15 = arith.constant 15 : index
    %c0_19 = arith.constant 0 : index
    %18 = vector.load %arg1[%c0_18, %c15, %c0_19] : memref<1x40x64xf32, #tpu.memory_space<vmem>>, vector<1x16x64xf32>
    %19 = vector.shape_cast %18 : vector<1x16x64xf32> to vector<16x64xf32>
    %c0_20 = arith.constant 0 : index
    %c384 = arith.constant 384 : index
    %20 = vector.load %arg5[%c0_20, %c384] : memref<16x640xf32, #tpu.memory_space<vmem>>, vector<16x64xf32>
    tpu.vector_store %arg5[%c0_20, %c384], %19 {strides = array<i32>} : memref<16x640xf32, #tpu.memory_space<vmem>>, vector<16x64xf32>,
    %c0_21 = arith.constant 0 : index
    %c0_22 = arith.constant 0 : index
    %c0_23 = arith.constant 0 : index
    %21 = vector.load %arg1[%c0_21, %c0_22, %c0_23] : memref<1x40x64xf32, #tpu.memory_space<vmem>>, vector<1x16x64xf32>
    %22 = vector.shape_cast %21 : vector<1x16x64xf32> to vector<16x64xf32>
    %c0_24 = arith.constant 0 : index
    %c448 = arith.constant 448 : index
    %23 = vector.load %arg5[%c0_24, %c448] : memref<16x640xf32, #tpu.memory_space<vmem>>, vector<16x64xf32>
    tpu.vector_store %arg5[%c0_24, %c448], %22 {strides = array<i32>} : memref<16x640xf32, #tpu.memory_space<vmem>>, vector<16x64xf32>,
    %c0_25 = arith.constant 0 : index
    %c18 = arith.constant 18 : index
    %c0_26 = arith.constant 0 : index
    %24 = vector.load %arg1[%c0_25, %c18, %c0_26] : memref<1x40x64xf32, #tpu.memory_space<vmem>>, vector<1x16x64xf32>
    %25 = vector.shape_cast %24 : vector<1x16x64xf32> to vector<16x64xf32>
    %c0_27 = arith.constant 0 : index
    %c512 = arith.constant 512 : index
    %26 = vector.load %arg5[%c0_27, %c512] : memref<16x640xf32, #tpu.memory_space<vmem>>, vector<16x64xf32>
    tpu.vector_store %arg5[%c0_27, %c512], %25 {strides = array<i32>} : memref<16x640xf32, #tpu.memory_space<vmem>>, vector<16x64xf32>,
    %cst = arith.constant dense<0.000000e+00> : vector<64xf32>
    %27 = vector.multi_reduction <add>, %1, %cst [0] : vector<16x64xf32> to vector<64xf32>
    %28 = vector.shape_cast %27 : vector<64xf32> to vector<1x64xf32>
    %29 = vector.shape_cast %28 : vector<1x64xf32> to vector<1x64xf32>
    %30 = vector.broadcast %29 : vector<1x64xf32> to vector<16x64xf32>
    %c0_28 = arith.constant 0 : index
    %c576 = arith.constant 576 : index
    %31 = vector.load %arg5[%c0_28, %c576] : memref<16x640xf32, #tpu.memory_space<vmem>>, vector<16x64xf32>
    tpu.vector_store %arg5[%c0_28, %c576], %30 {strides = array<i32>} : memref<16x640xf32, #tpu.memory_space<vmem>>, vector<16x64xf32>,
    %c0_29 = arith.constant 0 : index
    %c0_30 = arith.constant 0 : index
    %32 = vector.load %arg5[%c0_29, %c0_30] : memref<16x640xf32, #tpu.memory_space<vmem>>, vector<16x640xf32>
    %c0_31 = arith.constant 0 : index
    %c0_32 = arith.constant 0 : index
    %33 = vector.load %arg2[%c0_31, %c0_32] : memref<640x128xf32, #tpu.memory_space<vmem>>, vector<640x128xf32>
    %cst_33 = arith.constant dense<0.000000e+00> : vector<16x128xf32>
    %34 = tpu.matmul %32, %33, %cst_33 {dimension_numbers = #tpu.dot_dimension_numbers<[1], [0], [0], [1], [0, 0, 1, 1], [], []>} : vector<16x640xf32>, vector<640x128xf32>, vector<16x128xf32> -> vector<16x128xf32>
    %c0_34 = arith.constant 0 : index
    %c0_35 = arith.constant 0 : index
    %35 = vector.load %arg3[%c0_34, %c0_35] : memref<1x128xf32, #tpu.memory_space<vmem>>, vector<1x128xf32>
    %36 = vector.broadcast %35 : vector<1x128xf32> to vector<16x128xf32>
    %37 = arith.addf %34, %36 : vector<16x128xf32>
    %c0_36 = arith.constant 0 : index
    %c0_37 = arith.constant 0 : index
    %c0_38 = arith.constant 0 : index
    %38 = vector.load %arg4[%c0_36, %c0_37, %c0_38] : memref<1x16x128xf32, #tpu.memory_space<vmem>>, vector<1x16x128xf32>
    %39 = vector.shape_cast %38 : vector<1x16x128xf32> to vector<16x128xf32>
    %40 = vector.shape_cast %37 : vector<16x128xf32> to vector<1x16x128xf32>
    tpu.vector_store %arg4[%c0_36, %c0_37, %c0_38], %40 {strides = array<i32>} : memref<1x16x128xf32, #tpu.memory_space<vmem>>, vector<1x16x128xf32>,
    return
  }
  func.func @transform_0(%arg0: i32) -> (i32, i32, i32) {
    %c0_i32 = arith.constant 0 : i32
    %c0_i32_0 = arith.constant 0 : i32
    %c0_i32_1 = arith.constant 0 : i32
    return %arg0, %c0_i32, %c0_i32_0 : i32, i32, i32
  }
  func.func @transform_1(%arg0: i32) -> (i32, i32) {
    %c0_i32 = arith.constant 0 : i32
    %c0_i32_0 = arith.constant 0 : i32
    %c0_i32_1 = arith.constant 0 : i32
    return %c0_i32, %c0_i32_0 : i32, i32
  }
  func.func @transform_2(%arg0: i32) -> (i32, i32) {
    %c0_i32 = arith.constant 0 : i32
    %c0_i32_0 = arith.constant 0 : i32
    %c0_i32_1 = arith.constant 0 : i32
    return %c0_i32, %c0_i32_0 : i32, i32
  }
  func.func @transform_3(%arg0: i32) -> (i32, i32, i32) {
    %c0_i32 = arith.constant 0 : i32
    %c0_i32_0 = arith.constant 0 : i32
    %c0_i32_1 = arith.constant 0 : i32
    return %arg0, %c0_i32, %c0_i32_0 : i32, i32, i32
  }
}

</mosaic_0001>

<bundles_post_ra>
// kernel: tpu_custom_call.1
= control target key start
LH: loop header
LB: loop body
LE: loop exit
PB: predicated region body
PF: predicated region fallthrough
CT: control target
= control target key end

     0   :  { %8 = vsyncpa [#allocation4], 0  ;;  %s1054_s0 = inlined_call_operand.hbm [shape: f32[2,40,64], index: 0, kind: input, shape index: {}]   ;;  %s1055_s1 = inlined_call_operand.hbm [shape: f32[640,128], index: 1, kind: input, shape index: {}]   ;;  %s1056_s2 = inlined_call_operand.vmem [shape: f32[1,128], index: 2, kind: input, shape index: {}]   ;;  %s1057_s3 = inlined_call_operand.hbm [shape: f32[2,16,128], index: 3, kind: output, shape index: {}]  }
   0x1   :  { %10 = vsyncpa [#allocation4 + $0x1], 0 }
   0x2   :  { %11 = vsyncpa [#allocation7], 0 }
   0x3   :  { %12 = vsyncpa [#allocation5], 0 }
   0x4   :  { %14 = vsyncpa [#allocation5 + $0x1], 0  ;;  %s857_s12 = smov 0   ;;  %s859_s13 = smov 0  }
   0x5   :  { %s861_s14 = smov 0   ;;  %s863_s15 = smov 0  }
   0x6 LB: > { %s878_s16 = sadd.s32 4294967295, %s829_s15   ;;  %s603_s17 = sadd.s32 4294967294, %s829_s15   ;;  %s829_s15 = sphi %s863_s15, %s1069_s15   ;;  %s825_s14 = sphi %s861_s14, %s1068_s14   ;;  %s821_s13 = sphi %s859_s13, %s1067_s13   ;;  %s817_s12 = sphi %s857_s12, %s1066_s12  }
   0x7   : > { %p40_p0 = scmp.ne.s32.totalorder %s821_s13, %s817_s12  ;;  %p41_p1 = scmp.eq.s32.totalorder %s878_s16, 0 }
   0x8   : > { %p106_p2 = scmp.eq.s32.totalorder %s878_s16, 1  ;;  %p112_p3 = scmp.eq.s32.totalorder %s603_s17, 1 }
   0x9   : > { %p887_p4 = por %p41_p1, %p40_p0  ;;  %p604_p5 = scmp.ge.s32.totalorder %s829_s15, 1 }
   0xa   : > { %p892_p6 = por %p112_p3, %p40_p0  ;;  %p119_p7 = scmp.lt.s32.totalorder %s829_s15, 3 }
   0xb   : > { %s130_s22 = sshll.u32 %s1055_s1, 4  ;;  %s831_s24 = smov [#allocation6]   ;;  %s131_s22 = int_to_ptr.hbm [resolvable:$true] %s130_s22 }
   0xc   : > { %p900_p8 = pnand %p604_p5, %p119_p7  ;;  %s132_s25 = sshll.u32 %s831_s24, 4  ;;  %s133_s25 = int_to_ptr.vmem [resolvable:$true] %s132_s25 }
   0xd   : > { %s910_s26 = sadd.s32 1, %s829_s15   ;;  %s1058_s27 = smov 128  }
   0xe   : > { %p644_p9 = pneg %p900_p8  ;;  %s833_s28 = smov 8  }
   0xf   : > { %s24_s29 = ssub.s32 %s829_s15, %s910_s26  ;;  %s27_s30 = sadd.s32 1, %s825_s14 }
  0x10   : > { %p645_p10 = pnand %p644_p9, %p41_p1  ;;  %p25_p12 = scmp.eq.s32.totalorder %s24_s29, 0 }
  0x11   : > { %p34_p13 = scmp.ne.s32.totalorder %s825_s14, %s821_s13  ;;  %p35_p0 = scmp.eq.s32.totalorder %s829_s15, 0 }
  0x12   : > { %647 = dma.hbm_to_vmem [thread:$0]  (!%p645_p10), %s131_s22, 10240, %s133_s25, [#allocation7], %s1058_s27, %s1058_s27, %s833_s28  }
  0x13   : > { %p657_p3 = scmp.lt.s32.totalorder %s829_s15, 2  ;;  %p36_p5 = por %p35_p0, %p34_p13 }
  0x14   : > { %s923_s4 = scalar_select %p25_p12, %s825_s14, %s27_s30  }
  0x15   : > { %p927_p7 = por %p106_p2, %p34_p13  ;;  %s149_s6 = sand.u32 1, %s825_s14  }
  0x16   : > { %s634_s7 = smul.u32 40, %s829_s15  ;;  %p936_p9 = pnand %p657_p3, %p36_p5 }
  0x17   : > { %s633_s8 = smul.u32 40, %s149_s6  ;;  %s150_s24 = scalar_lea.sflag [#allocation4], %s149_s6 }
  0x18   : > { %s158_s11 = scalar_lea.hbm %s1054_s0, %s634_s7  ;;  %p733_p10 = pneg %p936_p9 }
  0x19   : > { %s159_s20 = sshll.u32 %s158_s11, 4  ;;  %s153_s21 = scalar_lea.vmem [#allocation3], %s633_s8  ;;  %s160_s20 = int_to_ptr.hbm [resolvable:$true] %s159_s20 }
  0x1a   : > { %s161_s22 = sshll.u32 %s153_s21, 4  ;;  %s729_s25 = sshra.s32 %s160_s20, 4  ;;  %s162_s22 = int_to_ptr.vmem [resolvable:$true] %s161_s22  ;;  %s730_s25 = int_to_ptr.hbm [resolvable:$true] %s729_s25 }
  0x1b   : > { %s731_s29 = scalar_lea.hbm %s730_s25, 40  ;;  %s736_s9 = scalar_lea.hbm %s1054_s0, 80 }
  0x1c   : > { %p732_p2 = scmp.ne.s32.totalorder %s730_s25, %s731_s29  ;;  %p737_p0 = scmp.lt.s32.totalorder %s730_s25, %s1054_s0 }
  0x1d   : > { %p738_p3 = scmp.lt.s32.totalorder %s736_s9, %s731_s29 }
  0x1e   : > { %p734_p12 = pnand %p733_p10, %p732_p2 }
  0x1f   : > { %p739_p5 = por %p738_p3, %p737_p0 }
  0x20   : > { %p735_p13 = pneg %p734_p12 }
  0x22   : > { %p740_p11 = pnand %p739_p5, %p735_p13 }
  0x24   : > { %743 = shalt.err (!%p740_p11)
}
  0x25   : > { %s1064_s6 = smov 128   ;;  %173 = sbr.rel (%p900_p8) target bundleno = 329 (0x149), region = 32 }
  0x26   : > { %651 = dma.hbm_to_vmem [thread:$0]  (!%p936_p9), %s160_s20, 640, %s162_s22, %s150_s24, %s1064_s6, %s1064_s6, %s833_s28  }
  0x27   : > { %s956_s8 = sand.u32 (!%p900_p8), 1, %s821_s13  }
  0x28   : > { %s635_s27 = smul.u32 (!%p900_p8), 40, %s956_s8  ;;  %s176_s11 = scalar_lea.sflag (!%p900_p8), [#allocation4], %s956_s8 }
  0x2a   : > { %s960_s21 = scalar_lea.vmem [#allocation3], %s635_s27 }
  0x2b   : > { %804 = dma.done.wait (%p887_p4), %s176_s11, 640  }
  0x2c   : > { %806 = vsyncadd (%p887_p4), %s176_s11, 4294966656 }
  0x2d   : > { %808 = dma.done.wait (%p41_p1), [#allocation7], 10240  }
  0x2e   : > { %810 = vsyncadd (%p41_p1), [#allocation7], 4294957056  ;;  %v246_v0 = vld [vmem:[%s960_s21 + $0x3] sm:$0xff]  ;;  %vm210_vm0 = vcmask 523264   ;;  %s834_s23 = smov 64   ;;  %v247_v3 = vld [vmem:[%s960_s21 + $0xb] sm:$0xff] }
  0x2f   : > { %v230_v1 = vld [vmem:[%s960_s21 + $0x6] sm:$0xff]  ;;  %250 = vrot.lane.b32.xlu0 %v246_v0, %s834_s23  ;;  %252 = vrot.lane.b32.xlu2 %v247_v3, %s834_s23  ;;  %v209_v5 = vld [vmem:[%s960_s21 + $0x11] sm:$0xff]  ;;  %vm223_vm1 = vcmask 1048064   ;;  %s610_s17 = sshll.u32 %s956_s8, 4  ;;  %s616_s20 = sshll.u32 %s878_s16, 4 }
  0x30   : > { %234 = vrot.lane.b32.xlu1 %v230_v1, %s834_s23  ;;  %v318_v2 = vld [vmem:[#allocation6 + $0x78] sm:$0xff]  ;;  %v317_v8 = vld [vmem:[#allocation6 + $0x70] sm:$0xff]  ;;  %v279_v9 = vsel %vm210_vm0, %v209_v5, 0.0  ;;  %212 = vst.msk [vmem:[#allocation2 + $0x28] sm:$0xff] %vm210_vm0, %v209_v5  ;;  %v316_v11 = vld [vmem:[#allocation6 + $0x68] sm:$0xff]  ;;  %s516_s25 = scalar_lea.hbm %s1057_s3, %s616_s20  ;;  %s207_s29 = scalar_lea.vmem [#allocation8], %s610_s17 }
  0x31   : > { %v208_v4 = vld [vmem:[%s960_s21 + $0x9] sm:$0xff]  ;;  %387 = vmatpush.msra.mxu0 %v318_v2  ;;  %v333_v10 = vld [vmem:[#allocation6 + $0xf0] sm:$0xff]  ;;  %s517_s30 = sshll.u32 %s207_s29, 4  ;;  %s519_s7 = sshll.u32 %s516_s25, 4  ;;  %s518_s30 = int_to_ptr.vmem [resolvable:$true] %s517_s30  ;;  %s520_s7 = int_to_ptr.hbm [resolvable:$true] %s519_s7 }
  0x32   : > { %v278_v6 = vsel %vm210_vm0, %v208_v4, 0.0  ;;  %211 = vst.msk [vmem:[#allocation2] sm:$0xff] %vm210_vm0, %v208_v4  ;;  %v334_v7 = vld [vmem:[#allocation6 + $0xf8] sm:$0xff]  ;;  %v332_v13 = vld [vmem:[#allocation6 + $0xe8] sm:$0xff]  ;;  %v315_v14 = vld [vmem:[#allocation6 + $0x60] sm:$0xff]  ;;  %s505_s16 = scalar_lea.sflag [#allocation5], %s956_s8 }
  0x33   : > { %410 = vmatpush.msra.mxu1 %v334_v7  ;;  %388 = vmatpush.msra.mxu0 %v317_v8  ;;  %v280_v12 = vadd.f32 %v279_v9, %v278_v6  ;;  %v350_v15 = vld [vmem:[#allocation6 + $0x178] sm:$0xff]  ;;  %v331_v19 = vld [vmem:[#allocation6 + $0xe0] sm:$0xff]  ;;  %v349_v22 = vld [vmem:[#allocation6 + $0x170] sm:$0xff]  ;;  %s773_s9 = sshra.s32 %s520_s7, 4  ;;  %s779_s11 = scalar_lea.hbm %s1057_s3, 32  ;;  %s774_s9 = int_to_ptr.hbm [resolvable:$true] %s773_s9 }
  0x34   : > { %v262_v16 = vld [vmem:[%s960_s21] sm:$0xff]  ;;  %v213_v17 = vld [vmem:[%s960_s21 + $0x8] sm:$0xff]  ;;  %433 = vmatpush.msra.mxu2 %v350_v15  ;;  %v214_v21 = vld [vmem:[%s960_s21 + $0x10] sm:$0xff]  ;;  %s775_s10 = scalar_lea.hbm %s774_s9, 16  ;;  %p780_p11 = scmp.lt.s32.totalorder %s774_s9, %s1057_s3 }
  0x35   : > { %411 = vmatpush.msra.mxu1 %v333_v10  ;;  %389 = vmatpush.msra.mxu0 %v316_v11  ;;  %v281_v18 = vrot.slane %v280_v12, 4  ;;  %v314_v20 = vld [vmem:[#allocation6 + $0x58] sm:$0xff]  ;;  %v313_v25 = vld [vmem:[#allocation6 + $0x50] sm:$0xff]  ;;  %v348_v26 = vld [vmem:[#allocation6 + $0x168] sm:$0xff]  ;;  %p776_p1 = scmp.ne.s32.totalorder %s774_s9, %s775_s10  ;;  %p781_p9 = scmp.lt.s32.totalorder %s779_s11, %s775_s10 }
  0x36   : > { %v330_v24 = vld [vmem:[#allocation6 + $0xd8] sm:$0xff]  ;;  %434 = vmatpush.msra.mxu2 %v349_v22  ;;  %v329_v29 = vld [vmem:[#allocation6 + $0xd0] sm:$0xff]  ;;  %v312_v30 = vld [vmem:[#allocation6 + $0x48] sm:$0xff] }
  0x37   : > { %412 = vmatpush.msra.mxu1 %v332_v13  ;;  %390 = vmatpush.msra.mxu0 %v315_v14  ;;  %v282_v23 = vadd.f32 %v281_v18, %v280_v12  ;;  %v366_v27 = vld [vmem:[#allocation6 + $0x1f8] sm:$0xff]  ;;  %v347_v31 = vld [vmem:[#allocation6 + $0x160] sm:$0xff]  ;;  %v365_v32 = vld [vmem:[#allocation6 + $0x1f0] sm:$0xff]  ;;  %p777_p4 = pnand %p776_p1, %p927_p7  ;;  %p782_p2 = por %p781_p9, %p780_p11 }
  0x38   : > { %266 = vrot.lane.b32.xlu1 %v262_v16, %s834_s23  ;;  %217 = vrot.lane.b32.xlu0 %v213_v17, %s834_s23  ;;  %v328_v34 = vld [vmem:[#allocation6 + $0xc8] sm:$0xff]  ;;  %v311_v35 = vld [vmem:[#allocation6 + $0x40] sm:$0xff]  ;;  %v346_v39 = vld [vmem:[#allocation6 + $0x158] sm:$0xff] }
  0x39   : > { %413 = vmatpush.msra.mxu1 %v331_v19  ;;  %391 = vmatpush.msra.mxu0 %v314_v20  ;;  %v283_v28 = vrot.slane %v282_v23, 2  ;;  %v231_v36 = vld [vmem:[%s960_s21 + $0xe] sm:$0xff]  ;;  %v345_v43 = vld [vmem:[#allocation6 + $0x150] sm:$0xff]  ;;  %p778_p8 = pneg %p777_p4 }
  0x3a   : > { %219 = vrot.lane.b32.xlu2 %v214_v21, %s834_s23  ;;  %435 = vmatpush.msra.mxu2 %v348_v26  ;;  %v327_v38 = vld [vmem:[#allocation6 + $0xc0] sm:$0xff]  ;;  %v310_v40 = vld [vmem:[#allocation6 + $0x38] sm:$0xff]  ;;  %v309_v44 = vld [vmem:[#allocation6 + $0x30] sm:$0xff] }
  0x3b   : > { %414 = vmatpush.msra.mxu1 %v330_v24  ;;  %392 = vmatpush.msra.mxu0 %v313_v25  ;;  %v284_v33 = vadd.f32 %v283_v28, %v282_v23  ;;  %v326_v42 = vld [vmem:[#allocation6 + $0xb8] sm:$0xff]  ;;  %v364_v45 = vld [vmem:[#allocation6 + $0x1e8] sm:$0xff]  ;;  %v325_v46 = vld [vmem:[#allocation6 + $0xb0] sm:$0xff]  ;;  %p783_p10 = pnand %p782_p2, %p778_p8 }
  0x3c   : > { %456 = vmatpush.msra.mxu3 %v366_v27  ;;  %436 = vmatpush.msra.mxu2 %v347_v31  ;;  %v344_v47 = vld [vmem:[#allocation6 + $0x148] sm:$0xff]  ;;  %v363_v49 = vld [vmem:[#allocation6 + $0x1e0] sm:$0xff]  ;;  %v362_v53 = vld [vmem:[#allocation6 + $0x1d8] sm:$0xff] }
  0x3d   : > { %415 = vmatpush.msra.mxu1 %v329_v29  ;;  %393 = vmatpush.msra.mxu0 %v312_v30  ;;  %v285_v37 = vrot.slane %v284_v33, 1  ;;  %v308_v48 = vld [vmem:[#allocation6 + $0x28] sm:$0xff]  ;;  %v343_v51 = vld [vmem:[#allocation6 + $0x140] sm:$0xff]  ;;  %v342_v55 = vld [vmem:[#allocation6 + $0x138] sm:$0xff] }
  0x3e   : > { %457 = vmatpush.msra.mxu3 %v365_v32  ;;  %437 = vmatpush.msra.mxu2 %v346_v39  ;;  %v324_v50 = vld [vmem:[#allocation6 + $0xa8] sm:$0xff]  ;;  %v307_v52 = vld [vmem:[#allocation6 + $0x20] sm:$0xff]  ;;  %v306_v56 = vld [vmem:[#allocation6 + $0x18] sm:$0xff] }
  0x3f   : > { %416 = vmatpush.msra.mxu1 %v328_v34  ;;  %394 = vmatpush.msra.mxu0 %v311_v35  ;;  %v286_v41 = vadd.f32 %v285_v37, %v284_v33  ;;  %v323_v54 = vld [vmem:[#allocation6 + $0xa0] sm:$0xff]  ;;  %v361_v57 = vld [vmem:[#allocation6 + $0x1d0] sm:$0xff]  ;;  %v322_v58 = vld [vmem:[#allocation6 + $0x98] sm:$0xff] }
  0x40   : > { %268 = vrot.lane.b32.xlu1 %v213_v17, %s834_s23  ;;  %236 = vrot.lane.b32.xlu0 %v231_v36, %s834_s23  ;;  %v341_v59 = vld [vmem:[#allocation6 + $0x130] sm:$0xff]  ;;  %v360_v61 = vld [vmem:[#allocation6 + $0x1c8] sm:$0xff]  ;;  %v359_v1 = vld [vmem:[#allocation6 + $0x1c0] sm:$0xff] }
  0x41   : > { %417 = vmatpush.msra.mxu1 %v327_v38  ;;  %395 = vmatpush.msra.mxu0 %v310_v40  ;;  %v305_v60 = vld [vmem:[#allocation6 + $0x10] sm:$0xff]  ;;  %v340_v63 = vld [vmem:[#allocation6 + $0x128] sm:$0xff]  ;;  %v339_v3 = vld [vmem:[#allocation6 + $0x120] sm:$0xff] }
  0x42   : > { %288 = vrot.lane.b32.xlu2 %v286_v41, %s834_s23  ;;  %438 = vmatpush.msra.mxu2 %v345_v43  ;;  %v321_v62 = vld [vmem:[#allocation6 + $0x90] sm:$0xff]  ;;  %v304_v0 = vld [vmem:[#allocation6 + $0x8] sm:$0xff]  ;;  %v303_v6 = vld [vmem:[#allocation6] sm:$0xff] }
  0x43   : > { %418 = vmatpush.msra.mxu1 %v326_v42  ;;  %396 = vmatpush.msra.mxu0 %v309_v44  ;;  %v320_v2 = vld [vmem:[#allocation6 + $0x88] sm:$0xff]  ;;  %v319_v7 = vld [vmem:[#allocation6 + $0x80] sm:$0xff]  ;;  %v338_v8 = vld [vmem:[#allocation6 + $0x118] sm:$0xff] }
  0x44   : > { %458 = vmatpush.msra.mxu3 %v364_v45  ;;  %439 = vmatpush.msra.mxu2 %v344_v47  ;;  %v242_v4 = vld [vmem:[%s960_s21 + $0xc] sm:$0xff]  ;;  %v337_v11 = vld [vmem:[#allocation6 + $0x110] sm:$0xff] }
  0x45   : > { %419 = vmatpush.msra.mxu1 %v325_v46  ;;  %397 = vmatpush.msra.mxu0 %v308_v48  ;;  %v226_v5 = vld [vmem:[%s960_s21 + $0xa] sm:$0xff]  ;;  %244 = vst.msk [vmem:[#allocation2 + $0x10] sm:$0xff] %vm210_vm0, %v242_v4  ;;  %v357_v12 = vld [vmem:[#allocation6 + $0x1b0] sm:$0xff] }
  0x46   : > { %459 = vmatpush.msra.mxu3 %v363_v49  ;;  %440 = vmatpush.msra.mxu2 %v343_v51  ;;  %228 = vst.msk [vmem:[#allocation2 + $0x8] sm:$0xff] %vm210_vm0, %v226_v5  ;;  %v358_v9 = vld [vmem:[#allocation6 + $0x1b8] sm:$0xff]  ;;  %v381_v13 = vld [vmem:[#allocation6 + $0x270] sm:$0xff]  ;;  %v336_v14 = vld [vmem:[#allocation6 + $0x108] sm:$0xff] }
  0x47   : > { %420 = vmatpush.msra.mxu1 %v324_v50  ;;  %398 = vmatpush.msra.mxu0 %v307_v52  ;;  %v382_v10 = vld [vmem:[#allocation6 + $0x278] sm:$0xff]  ;;  %v356_v15 = vld [vmem:[#allocation6 + $0x1a8] sm:$0xff]  ;;  %v335_v17 = vld [vmem:[#allocation6 + $0x100] sm:$0xff] }
  0x48   : > { %460 = vmatpush.msra.mxu3 %v362_v53  ;;  %441 = vmatpush.msra.mxu2 %v342_v55  ;;  %v380_v16 = vld [vmem:[#allocation6 + $0x268] sm:$0xff]  ;;  %v355_v18 = vld [vmem:[#allocation6 + $0x1a0] sm:$0xff]  ;;  %v354_v23 = vld [vmem:[#allocation6 + $0x198] sm:$0xff] }
  0x49   : > { %421 = vmatpush.msra.mxu1 %v323_v54  ;;  %399 = vmatpush.msra.mxu0 %v306_v56  ;;  %v243_v19 = vld [vmem:[%s960_s21 + $0x14] sm:$0xff]  ;;  %v378_v24 = vld [vmem:[#allocation6 + $0x258] sm:$0xff] }
  0x4a   : > { %461 = vmatpush.msra.mxu3 %v361_v57  ;;  %442 = vmatpush.msra.mxu2 %v341_v59  ;;  %v258_v20 = vld [vmem:[%s960_s21 + $0xf] sm:$0xff]  ;;  %245 = vst.msk [vmem:[#allocation2 + $0x38] sm:$0xff] %vm210_vm0, %v243_v19  ;;  %v353_v25 = vld [vmem:[#allocation6 + $0x190] sm:$0xff] }
  0x4b   : > { %422 = vmatpush.msra.mxu1 %v322_v58  ;;  %400 = vmatpush.msra.mxu0 %v305_v60  ;;  %v379_v21 = vld [vmem:[#allocation6 + $0x260] sm:$0xff]  ;;  %260 = vst.msk [vmem:[#allocation2 + $0x18] sm:$0xff] %vm210_vm0, %v258_v20  ;;  %v377_v26 = vld [vmem:[#allocation6 + $0x250] sm:$0xff]  ;;  %v352_v27 = vld [vmem:[#allocation6 + $0x188] sm:$0xff] }
  0x4c   : > { %462 = vmatpush.msra.mxu3 %v360_v61  ;;  %443 = vmatpush.msra.mxu2 %v340_v63  ;;  %v259_v28 = vld [vmem:[%s960_s21 + $0x17] sm:$0xff]  ;;  %v374_v34 = vld [vmem:[#allocation6 + $0x238] sm:$0xff]  ;;  %v698_v60 = vld [vmem:[%s1056_s2] ss:$0 sm:$0xff] }
  0x4d   : > { %423 = vmatpush.msra.mxu1 %v321_v62  ;;  %401 = vmatpush.msra.mxu0 %v304_v0  ;;  %v376_v29 = vld [vmem:[#allocation6 + $0x248] sm:$0xff]  ;;  %261 = vst.msk [vmem:[#allocation2 + $0x40] sm:$0xff] %vm210_vm0, %v259_v28  ;;  %v351_v30 = vld [vmem:[#allocation6 + $0x180] sm:$0xff]  ;;  %v373_v35 = vld [vmem:[#allocation6 + $0x230] sm:$0xff] }
  0x4e   : > { %463 = vmatpush.msra.mxu3 %v359_v1  ;;  %444 = vmatpush.msra.mxu2 %v339_v3  ;;  %v375_v31 = vld [vmem:[#allocation6 + $0x240] sm:$0xff]  ;;  %v275_v36 = vld [vmem:[%s960_s21 + $0x1a] sm:$0xff] }
  0x4f   : > { %424 = vmatpush.msra.mxu1 %v320_v2  ;;  %402 = vmatpush.msra.mxu0 %v303_v6  ;;  %v227_v32 = vld [vmem:[%s960_s21 + $0x12] sm:$0xff]  ;;  %277 = vst.msk [vmem:[#allocation2 + $0x48] sm:$0xff] %vm210_vm0, %v275_v36  ;;  %v370_v40 = vld [vmem:[#allocation6 + $0x218] sm:$0xff] }
  0x50   : > { %445 = vmatpush.msra.mxu2 %v338_v8  ;;  %464 = vmatpush.msra.mxu3 %v358_v9  ;;  %229 = vst.msk [vmem:[#allocation2 + $0x30] sm:$0xff] %vm210_vm0, %v227_v32  ;;  %v372_v37 = vld [vmem:[#allocation6 + $0x228] sm:$0xff]  ;;  %v371_v38 = vld [vmem:[#allocation6 + $0x220] sm:$0xff]  ;;  %v369_v41 = vld [vmem:[#allocation6 + $0x210] sm:$0xff] }
  0x51   : > { %425 = vmatpush.msra.mxu1 %v319_v7  ;;  %479 = vmatpush.msrb.mxu0 %v382_v10  ;;  %276 = vst.msk [vmem:[#allocation2 + $0x20] sm:$0xff] %vm210_vm0, %v227_v32  ;;  %v368_v42 = vld [vmem:[#allocation6 + $0x208] sm:$0xff]  ;;  %v367_v43 = vld [vmem:[#allocation6 + $0x200] sm:$0xff] }
  0x52   : > { %446 = vmatpush.msra.mxu2 %v337_v11  ;;  %465 = vmatpush.msra.mxu3 %v357_v12 }
  0x53   : > { %617 = vmatpush.msrb.mxu1 %v382_v10  ;;  %480 = vmatpush.msrb.mxu0 %v381_v13 }
  0x54   : > { %447 = vmatpush.msra.mxu2 %v336_v14  ;;  %466 = vmatpush.msra.mxu3 %v356_v15 }
  0x55   : > { %618 = vmatpush.msrb.mxu1 %v381_v13  ;;  %481 = vmatpush.msrb.mxu0 %v380_v16 }
  0x56   : > { %448 = vmatpush.msra.mxu2 %v335_v17  ;;  %467 = vmatpush.msra.mxu3 %v355_v18 }
  0x57   : > { %619 = vmatpush.msrb.mxu1 %v380_v16  ;;  %482 = vmatpush.msrb.mxu0 %v379_v21 }
  0x58   : > { %468 = vmatpush.msra.mxu3 %v354_v23 }
  0x59   : > { %620 = vmatpush.msrb.mxu1 %v379_v21  ;;  %483 = vmatpush.msrb.mxu0 %v378_v24 }
  0x5a   : > { %469 = vmatpush.msra.mxu3 %v353_v25 }
  0x5b   : > { %621 = vmatpush.msrb.mxu1 %v378_v24  ;;  %484 = vmatpush.msrb.mxu0 %v377_v26 }
  0x5c   : > { %470 = vmatpush.msra.mxu3 %v352_v27 }
  0x5d   : > { %622 = vmatpush.msrb.mxu1 %v377_v26  ;;  %485 = vmatpush.msrb.mxu0 %v376_v29 }
  0x5e   : > { %471 = vmatpush.msra.mxu3 %v351_v30 }
  0x5f   : > { %623 = vmatpush.msrb.mxu1 %v376_v29  ;;  %486 = vmatpush.msrb.mxu0 %v375_v31 }
  0x61   : > { %624 = vmatpush.msrb.mxu1 %v375_v31  ;;  %487 = vmatpush.msrb.mxu0 %v374_v34 }
  0x63   : > { %625 = vmatpush.msrb.mxu1 %v374_v34  ;;  %488 = vmatpush.msrb.mxu0 %v373_v35 }
  0x65   : > { %626 = vmatpush.msrb.mxu1 %v373_v35  ;;  %489 = vmatpush.msrb.mxu0 %v372_v37 }
  0x67   : > { %627 = vmatpush.msrb.mxu1 %v372_v37  ;;  %490 = vmatpush.msrb.mxu0 %v371_v38 }
  0x69   : > { %628 = vmatpush.msrb.mxu1 %v371_v38  ;;  %491 = vmatpush.msrb.mxu0 %v370_v40 }
  0x6b   : > { %629 = vmatpush.msrb.mxu1 %v370_v40  ;;  %492 = vmatpush.msrb.mxu0 %v369_v41 }
  0x6d   : > { %630 = vmatpush.msrb.mxu1 %v369_v41  ;;  %493 = vmatpush.msrb.mxu0 %v368_v42 }
  0x6f   : > { %631 = vmatpush.msrb.mxu1 %v368_v42  ;;  %494 = vmatpush.msrb.mxu0 %v367_v43 }
  0x71   : > { %632 = vmatpush.msrb.mxu1 %v367_v43 }
  0x89   : > { %v253_v22 = vpop.permute.xlu2 %252 }
  0x8a   : > { %257 = vst.msk [vmem:[#allocation2 + $0x38] sm:$0xff] %vm223_vm1, %v253_v22 }
  0x91   : > { %v300_v50 = vld [vmem:[#allocation2 + $0x38] sm:$0xff] }
  0x94   : > { %v220_v33 = vpop.permute.xlu2 %219 }
  0x95   : > { %225 = vst.msk [vmem:[#allocation2 + $0x28] sm:$0xff] %vm223_vm1, %v220_v33 }
  0x9c   : > { %v289_v39 = vpop.permute.xlu2 %288  ;;  %v298_v55 = vld [vmem:[#allocation2 + $0x28] sm:$0xff] }
  0x9d   : > { %291 = vst.msk [vmem:[#allocation2 + $0x20] sm:$0xff] %vm223_vm1, %v289_v39 }
  0x9e   : > { %292 = vst.msk [vmem:[#allocation2 + $0x48] sm:$0xff] %vm223_vm1, %v289_v39 }
  0xa1   : > { %v251_v44 = vpop.permute.xlu0 %250 }
  0xa2   : > { %v235_v45 = vpop.permute.xlu1 %234  ;;  %256 = vst.msk [vmem:[#allocation2 + $0x10] sm:$0xff] %vm223_vm1, %v251_v44 }
  0xa3   : > { %240 = vst.msk [vmem:[#allocation2 + $0x8] sm:$0xff] %vm223_vm1, %v235_v45 }
  0xa4   : > { %v297_v58 = vld [vmem:[#allocation2 + $0x20] sm:$0xff] }
  0xa5   : > { %v302_v59 = vld [vmem:[#allocation2 + $0x48] sm:$0xff] }
  0xa9   : > { %v295_v48 = vld [vmem:[#allocation2 + $0x10] sm:$0xff] }
  0xaa   : > { %v267_v46 = vpop.permute.xlu1 %266  ;;  %v218_v47 = vpop.permute.xlu0 %217  ;;  %v294_v49 = vld [vmem:[#allocation2 + $0x8] sm:$0xff]  ;;  %449 = vmatmul.f32.vlgmr.msra.gmra.mxu2 %v295_v48 }
  0xab   : > { %272 = vst.msk [vmem:[#allocation2 + $0x18] sm:$0xff] %vm223_vm1, %v267_v46  ;;  %426 = vmatmul.f32.vlgmr.msra.gmra.mxu1 %v294_v49 }
  0xac   : > { %224 = vst.msk [vmem:[#allocation2] sm:$0xff] %vm223_vm1, %v218_v47 }
  0xb2   : > { %v269_v51 = vpop.permute.xlu1 %268  ;;  %v237_v52 = vpop.permute.xlu0 %236  ;;  %v296_v53 = vld [vmem:[#allocation2 + $0x18] sm:$0xff]  ;;  %452 = vmatmul.f32.gmra.mxu2 %v300_v50 }
  0xb3   : > { %273 = vst.msk [vmem:[#allocation2 + $0x40] sm:$0xff] %vm223_vm1, %v269_v51  ;;  %v293_v54 = vld [vmem:[#allocation2] sm:$0xff]  ;;  %472 = vmatmul.f32.vlgmr.msra.gmra.mxu3 %v296_v53 }
  0xb4   : > { %241 = vst.msk [vmem:[#allocation2 + $0x30] sm:$0xff] %vm223_vm1, %v237_v52  ;;  %403 = vmatmul.f32.vlgmr.msra.gmra.mxu0 %v293_v54 }
  0xba   : > { %v301_v56 = vld [vmem:[#allocation2 + $0x40] sm:$0xff] }
  0xbb   : > { %v299_v57 = vld [vmem:[#allocation2 + $0x30] sm:$0xff]  ;;  %475 = vmatmul.f32.gmra.mxu3 %v301_v56 }
  0xbc   : > { %406 = vmatmul.f32.gmra.mxu0 %v298_v55  ;;  %429 = vmatmul.f32.gmra.mxu1 %v299_v57 }
  0xc4   : > { %495 = vmatmul.f32.vlgmr.msrb.gmra.mxu0 %v297_v58  ;;  %498 = vmatmul.f32.vlgmr.msrb.gmra.mxu1 %v302_v59 }
 0x128   : > { %v427_v61 = vpop.f32.mrf.mxu1 }
 0x12d   : > { %v450_v63 = vpop.f32.mrf.mxu2 }
 0x131   : > { %v404_v62 = vpop.f32.mrf.mxu0 }
 0x132   : > { %v405_v0 = vadd.f32 %v698_v60, %v404_v62 }
 0x134   : > { %v428_v2 = vadd.f32 %v427_v61, %v405_v0 }
 0x135   : > { %v453_v8 = vpop.f32.mrf.mxu2 }
 0x136   : > { %v473_v1 = vpop.f32.mrf.mxu3  ;;  %v451_v6 = vadd.f32 %v450_v63, %v428_v2 }
 0x138   : > { %v474_v11 = vadd.f32 %v473_v1, %v451_v6 }
 0x139   : > { %v407_v3 = vpop.f32.mrf.mxu0  ;;  %v430_v4 = vpop.f32.mrf.mxu1 }
 0x13a   : > { %v408_v5 = vadd.f32 %v698_v60, %v407_v3 }
 0x13c   : > { %v431_v7 = vadd.f32 %v430_v4, %v408_v5 }
 0x13e   : > { %v454_v9 = vadd.f32 %v453_v8, %v431_v7  ;;  %v476_v10 = vpop.f32.mrf.mxu3 }
 0x140   : > { %v477_v12 = vadd.f32 %v476_v10, %v454_v9 }
 0x141   : > { %v496_v13 = vpop.f32.mrf.mxu0  ;;  %v499_v14 = vpop.f32.mrf.mxu1 }
 0x142   : > { %v497_v15 = vadd.f32 %v496_v13, %v474_v11  ;;  %v500_v16 = vadd.f32 %v499_v14, %v477_v12 }
 0x144   : > { %502 = vst [vmem:[%s207_s29] sm:$0xff] %v497_v15 }
 0x145   : > { %503 = vst [vmem:[%s207_s29 + $0x8] sm:$0xff] %v500_v16 }
 0x146   : > { %786 = shalt.err (!%p783_p10)
}
 0x147   : > { %s835_s8 = smov 128   ;;  %s836_s18 = smov 8  }
 0x148   : > { %642 = dma.vmem_to_hbm [thread:$0]  (%p927_p7), %s518_s30, 256, %s520_s7, %s505_s16, %s835_s8, %s835_s8, %s836_s18  }
 0x149 PF: > { %s534_s28 = sand.u32 1, %s817_s12   ;;  %p1065_p12 = scmp.ge.s32.totalorder %s829_s15, 2 }
 0x14a   : > { %s535_s17 = scalar_lea.sflag [#allocation5], %s534_s28 }
 0x14b   : > { %p653_p13 = pnand %p1065_p12, %p892_p6 }
 0x14d   : > { %p654_p0 = pneg %p653_p13 }
 0x14f   : > { %812 = dma.done.wait (%p654_p0), %s535_s17, 256  }
 0x150   : > { %814 = vsyncadd (%p654_p0), %s535_s17, 4294967040  ;;  %p17_p3 = scmp.ge.s32.totalorder %s910_s26, 4   ;;  %s1066_s12 = smov %s821_s13 }
 0x151   : > { %s1067_s13 = smov %s825_s14  ;;  %s1068_s14 = smov %s923_s4 }
 0x152   : > { %s1069_s15 = smov %s910_s26  ;;  %19 = sbr.rel (!%p17_p3) target bundleno = 6 (0x6), region = 81 }
 0x157   :  { %541 = vsyncpa [#allocation4], 1 }
 0x158   :  { %543 = vsyncpa [#allocation4 + $0x1], 1 }
 0x159   :  { %544 = vsyncpa [#allocation7], 1 }
 0x15a   :  { %545 = vsyncpa [#allocation5], 1 }
 0x15b   :  { %547 = vsyncpa [#allocation5 + $0x1], 1 }

</bundles_post_ra>
